<compile_context>
chip_gen: v5e
topology: v5e:2x2
jax: 0.10.0
libtpu: 0.0.40
codegen_flags: <defaults>
</compile_context>

<pallas_src>
from functools import partial

import numpy as np
import jax
import jax.numpy as jnp
from jax.experimental import pallas as pl
from jax.experimental.pallas import tpu as pltpu


# ------------------------- Pallas kernel (hot path) -------------------------

def seasonality_block_kernel(x_ref,
                             w1_ref, b1_ref,
                             w2_ref, b2_ref,
                             w3_ref, b3_ref,
                             w4_ref, b4_ref,
                             wout_ref,
                             out_ref):
    # 4 x (Linear + ReLU): bf16 operands on the MXU, f32 accumulation;
    # bias-add / ReLU in f32 on the VPU, re-cast to bf16 for the next dot.
    def fc(h_bf16, w_ref, b_ref):
        acc = jnp.dot(h_bf16, w_ref[...], preferred_element_type=jnp.float32)
        return jnp.maximum(acc + b_ref[...], 0.0).astype(jnp.bfloat16)

    h = fc(x_ref[...], w1_ref, b1_ref)
    h = fc(h, w2_ref, b2_ref)
    h = fc(h, w3_ref, b3_ref)
    h = fc(h, w4_ref, b4_ref)

    # Theta projection + seasonality basis folded offline into one resident
    # weight: a single full-depth matmul and one lane-dense bf16 store.
    out_ref[...] = jnp.dot(h, wout_ref[...],
                           preferred_element_type=jnp.float32
                           ).astype(out_ref.dtype)


# ------------------------------ JAX glue code --------------------------------

def linspace(backcast_length, forecast_length):
    lin_space = np.linspace(-backcast_length, forecast_length,
                            backcast_length + forecast_length)
    return lin_space[:backcast_length], lin_space[backcast_length:]


def seasonality_basis(thetas_dim, t):
    # Matches seasonality_model(): S = cat([cos(2*pi*i*t) for i<p1],
    #                                      [sin(2*pi*i*t) for i<p2])
    p = thetas_dim
    p1, p2 = (p // 2, p // 2) if p % 2 == 0 else (p // 2, p // 2 + 1)
    s1 = np.stack([np.cos(2 * np.pi * i * t) for i in range(p1)], axis=0)
    s2 = np.stack([np.sin(2 * np.pi * i * t) for i in range(p2)], axis=0)
    S = np.concatenate([s1, s2], axis=0).astype(np.float32)  # (p, len(t))
    return jnp.asarray(S)


def init_params(key, units, thetas_dim, backcast_length):
    """Deterministic init matching nn.Linear; weights stored as (in, out)."""
    ks = jax.random.split(key, 10)

    def lin(kw, kb, fan_in, fan_out, bias=True):
        bound = 1.0 / np.sqrt(fan_in)
        w = jax.random.uniform(kw, (fan_in, fan_out), jnp.float32,
                               -bound, bound)
        if not bias:
            return w, None
        b = jax.random.uniform(kb, (1, fan_out), jnp.float32, -bound, bound)
        return w, b

    w1, b1 = lin(ks[0], ks[1], backcast_length, units)
    w2, b2 = lin(ks[2], ks[3], units, units)
    w3, b3 = lin(ks[4], ks[5], units, units)
    w4, b4 = lin(ks[6], ks[7], units, units)
    # share_thetas=True -> theta_b_fc is theta_f_fc (single weight, no bias)
    wt, _ = lin(ks[8], ks[9], units, thetas_dim, bias=False)
    return (w1, b1, w2, b2, w3, b3, w4, b4, wt)


def _num_tensorcores():
    """Best-effort TensorCore count per chip (v7x = 2, v5e/v6e = 1)."""
    try:
        info = pltpu.get_tpu_info()
        for name in ("num_cores", "core_count", "tensorcore_count",
                     "num_tensorcores"):
            v = getattr(info, name, None)
            if v:
                return max(1, int(v))
    except Exception:
        pass
    try:
        return max(1, int(getattr(jax.devices()[0], "num_cores", 1)))
    except Exception:
        return 1


def _choose_batch_tile(batch, n_cores, max_tile=1024):
    """Biggest tile (fewest grid steps) that still gives n_cores parallel steps."""
    b8 = ((batch + 7) // 8) * 8                 # sublane granule
    bt = min(max_tile, b8)
    if n_cores > 1:
        per_core = -(-b8 // n_cores)            # keep >= n_cores grid steps
        bt = min(bt, ((per_core + 7) // 8) * 8)
    return max(8, (bt // 8) * 8)


def prepare_kernel_weights(params, S_b, S_f):
    """One-time prep: fold wt@[S_b|S_f], pad K and output lanes, cast to bf16."""
    w1, b1, w2, b2, w3, b3, w4, b4, wt = params
    back_len = S_b.shape[1]
    fore_len = S_f.shape[1]
    total_len = back_len + fore_len

    # Fold the shared theta projection into the seasonality bases (f32 fold),
    # then pad the concatenated output lanes up to a multiple of 128.
    w_out = wt @ jnp.concatenate([S_b, S_f], axis=1)     # (units, total_len)
    out_pad = (-total_len) % 128
    if out_pad:
        w_out = jnp.pad(w_out, ((0, 0), (0, out_pad)))

    # Pad first-layer contraction dim (backcast_length) to a multiple of 128
    # so the x tile and first matmul K are lane-dense (zeros are free).
    L = w1.shape[0]
    k_pad = (-L) % 128
    if k_pad:
        w1 = jnp.pad(w1, ((0, k_pad), (0, 0)))

    cast = lambda w: w.astype(jnp.bfloat16)
    weights = (cast(w1), b1, cast(w2), b2, cast(w3), b3, cast(w4), b4,
               cast(w_out))
    weights = jax.block_until_ready(weights)   # materialize once, off hot path
    meta = (back_len, fore_len, L + k_pad, total_len + out_pad)
    return weights, meta


@partial(jax.jit,
         static_argnames=("back_len", "fore_len", "l_pad", "total_pad",
                          "block_b"))
def _seasonality_forward_impl(x, weights, *, back_len, fore_len, l_pad,
                              total_pad, block_b):
    B, L = x.shape
    bt = block_b
    pad_b = (-B) % bt
    Bp = B + pad_b
    grid = (Bp // bt,)

    x_bf = jnp.pad(x.astype(jnp.bfloat16), ((0, pad_b), (0, l_pad - L)))

    units = weights[0].shape[1]
    flops = int(2 * Bp * (l_pad * units + 3 * units * units
                          + units * total_pad))
    bytes_accessed = int(
        Bp * l_pad * 2                                           # x (bf16)
        + sum(int(np.prod(w.shape)) * jnp.dtype(w.dtype).itemsize
              for w in weights)                                  # weights
        + Bp * total_pad * 2)                                    # out (bf16)

    const = lambda a: pl.BlockSpec(a.shape, lambda i: (0,) * a.ndim)
    in_specs = ([pl.BlockSpec((bt, l_pad), lambda i: (i, 0))]
                + [const(a) for a in weights])

    out = pl.pallas_call(
        seasonality_block_kernel,
        out_shape=jax.ShapeDtypeStruct((Bp, total_pad), jnp.bfloat16),
        grid=grid,
        in_specs=in_specs,
        out_specs=pl.BlockSpec((bt, total_pad), lambda i: (i, 0)),
        compiler_params=pltpu.CompilerParams(
            dimension_semantics=("parallel",)),
        cost_estimate=pl.CostEstimate(flops=flops, transcendentals=0,
                                      bytes_accessed=bytes_accessed),
    )(x_bf, *weights)

    out = out[:B].astype(jnp.float32)
    return out[:, :back_len], out[:, back_len:back_len + fore_len]


def seasonality_block_forward(x, prepared, *, max_block_b=1024):
    weights, (back_len, fore_len, l_pad, total_pad) = prepared
    bt = _choose_batch_tile(x.shape[0], _num_tensorcores(), max_block_b)
    return _seasonality_forward_impl(
        x, weights, back_len=back_len, fore_len=fore_len,
        l_pad=l_pad, total_pad=total_pad, block_b=bt)


def reference_forward(x, params, S_b, S_f):
    # Pure-f32, unfused reference matching the PyTorch module math.
    w1, b1, w2, b2, w3, b3, w4, b4, wt = params
    h = jax.nn.relu(x @ w1 + b1)
    h = jax.nn.relu(h @ w2 + b2)
    h = jax.nn.relu(h @ w3 + b3)
    h = jax.nn.relu(h @ w4 + b4)
    thetas = h @ wt
    return thetas @ S_b, thetas @ S_f


if __name__ == "__main__":
    # Small but MXU-friendly shapes consistent with the module semantics.
    batch = 256
    backcast_length = 96
    forecast_length = 32
    units = 128
    thetas_dim = forecast_length  # nb_harmonics=None path

    key = jax.random.PRNGKey(0)
    kx, kp = jax.random.split(key)
    x = jax.random.normal(kx, (batch, backcast_length), dtype=jnp.float32)

    params = init_params(kp, units, thetas_dim, backcast_length)

    b_ls, f_ls = linspace(backcast_length, forecast_length)
    S_b = seasonality_basis(thetas_dim, b_ls)  # (thetas_dim, backcast_length)
    S_f = seasonality_basis(thetas_dim, f_ls)  # (thetas_dim, forecast_length)

    prepared = prepare_kernel_weights(params, S_b, S_f)

    backcast, forecast = seasonality_block_forward(x, prepared)
    jax.block_until_ready((backcast, forecast))

    # bf16 matmul operands / bf16 output store + folded basis change rounding
    # vs the f32 reference; tolerance relaxed accordingly (still catches any
    # structural error).
    ref_b, ref_f = reference_forward(x, params, S_b, S_f)
    np.testing.assert_allclose(np.asarray(backcast), np.asarray(ref_b),
                               rtol=5e-2, atol=5e-2)
    np.testing.assert_allclose(np.asarray(forecast), np.asarray(ref_f),
                               rtol=5e-2, atol=5e-2)

    print("KERNEL_OK")
</pallas_src>

<mosaic_0001>
module attributes {stable_mosaic.version = 11 : i64} {
  func.func @seasonality_block_kernel(%arg0: i32, %arg1: memref<256x128xbf16, #tpu.memory_space<vmem>>, %arg2: memref<128x128xbf16, #tpu.memory_space<vmem>>, %arg3: memref<1x128xf32, #tpu.memory_space<vmem>>, %arg4: memref<128x128xbf16, #tpu.memory_space<vmem>>, %arg5: memref<1x128xf32, #tpu.memory_space<vmem>>, %arg6: memref<128x128xbf16, #tpu.memory_space<vmem>>, %arg7: memref<1x128xf32, #tpu.memory_space<vmem>>, %arg8: memref<128x128xbf16, #tpu.memory_space<vmem>>, %arg9: memref<1x128xf32, #tpu.memory_space<vmem>>, %arg10: memref<128x128xbf16, #tpu.memory_space<vmem>>, %arg11: memref<256x128xbf16, #tpu.memory_space<vmem>>) attributes {dimension_semantics = [#tpu.dimension_semantics<parallel>], iteration_bounds = array<i64: 1>, scalar_prefetch = 0 : i64, scratch_operands = 0 : i64, tpu.core_type = #tpu.core_type<tc>, window_params = [{transform_indices = @transform_0, window_bounds = array<i64: 256, 128>}, {pipeline_mode = #tpu.pipeline_mode<synchronous>, transform_indices = @transform_1, window_bounds = array<i64: 128, 128>}, {pipeline_mode = #tpu.pipeline_mode<synchronous>, transform_indices = @transform_2, window_bounds = array<i64: 1, 128>}, {pipeline_mode = #tpu.pipeline_mode<synchronous>, transform_indices = @transform_3, window_bounds = array<i64: 128, 128>}, {pipeline_mode = #tpu.pipeline_mode<synchronous>, transform_indices = @transform_4, window_bounds = array<i64: 1, 128>}, {pipeline_mode = #tpu.pipeline_mode<synchronous>, transform_indices = @transform_5, window_bounds = array<i64: 128, 128>}, {pipeline_mode = #tpu.pipeline_mode<synchronous>, transform_indices = @transform_6, window_bounds = array<i64: 1, 128>}, {pipeline_mode = #tpu.pipeline_mode<synchronous>, transform_indices = @transform_7, window_bounds = array<i64: 128, 128>}, {pipeline_mode = #tpu.pipeline_mode<synchronous>, transform_indices = @transform_8, window_bounds = array<i64: 1, 128>}, {pipeline_mode = #tpu.pipeline_mode<synchronous>, transform_indices = @transform_9, window_bounds = array<i64: 128, 128>}, {transform_indices = @transform_10, window_bounds = array<i64: 256, 128>}]} {
    %c0 = arith.constant 0 : index
    %c0_0 = arith.constant 0 : index
    %0 = vector.load %arg1[%c0, %c0_0] : memref<256x128xbf16, #tpu.memory_space<vmem>>, vector<256x128xbf16>
    %c0_1 = arith.constant 0 : index
    %c0_2 = arith.constant 0 : index
    %1 = vector.load %arg2[%c0_1, %c0_2] : memref<128x128xbf16, #tpu.memory_space<vmem>>, vector<128x128xbf16>
    %cst = arith.constant dense<0.000000e+00> : vector<256x128xf32>
    %2 = tpu.matmul %0, %1, %cst {dimension_numbers = #tpu.dot_dimension_numbers<[1], [0], [0], [1], [0, 0, 1, 1], [], []>} : vector<256x128xbf16>, vector<128x128xbf16>, vector<256x128xf32> -> vector<256x128xf32>
    %c0_3 = arith.constant 0 : index
    %c0_4 = arith.constant 0 : index
    %3 = vector.load %arg3[%c0_3, %c0_4] : memref<1x128xf32, #tpu.memory_space<vmem>>, vector<1x128xf32>
    %4 = vector.broadcast %3 : vector<1x128xf32> to vector<256x128xf32>
    %5 = arith.addf %2, %4 : vector<256x128xf32>
    %cst_5 = arith.constant 0.000000e+00 : f32
    %6 = vector.broadcast %cst_5 : f32 to vector<256x128xf32>
    %7 = arith.maximumf %5, %6 : vector<256x128xf32>
    %8 = arith.truncf %7 : vector<256x128xf32> to vector<256x128xbf16>
    %c0_6 = arith.constant 0 : index
    %c0_7 = arith.constant 0 : index
    %9 = vector.load %arg4[%c0_6, %c0_7] : memref<128x128xbf16, #tpu.memory_space<vmem>>, vector<128x128xbf16>
    %cst_8 = arith.constant dense<0.000000e+00> : vector<256x128xf32>
    %10 = tpu.matmul %8, %9, %cst_8 {dimension_numbers = #tpu.dot_dimension_numbers<[1], [0], [0], [1], [0, 0, 1, 1], [], []>} : vector<256x128xbf16>, vector<128x128xbf16>, vector<256x128xf32> -> vector<256x128xf32>
    %c0_9 = arith.constant 0 : index
    %c0_10 = arith.constant 0 : index
    %11 = vector.load %arg5[%c0_9, %c0_10] : memref<1x128xf32, #tpu.memory_space<vmem>>, vector<1x128xf32>
    %12 = vector.broadcast %11 : vector<1x128xf32> to vector<256x128xf32>
    %13 = arith.addf %10, %12 : vector<256x128xf32>
    %cst_11 = arith.constant 0.000000e+00 : f32
    %14 = vector.broadcast %cst_11 : f32 to vector<256x128xf32>
    %15 = arith.maximumf %13, %14 : vector<256x128xf32>
    %16 = arith.truncf %15 : vector<256x128xf32> to vector<256x128xbf16>
    %c0_12 = arith.constant 0 : index
    %c0_13 = arith.constant 0 : index
    %17 = vector.load %arg6[%c0_12, %c0_13] : memref<128x128xbf16, #tpu.memory_space<vmem>>, vector<128x128xbf16>
    %cst_14 = arith.constant dense<0.000000e+00> : vector<256x128xf32>
    %18 = tpu.matmul %16, %17, %cst_14 {dimension_numbers = #tpu.dot_dimension_numbers<[1], [0], [0], [1], [0, 0, 1, 1], [], []>} : vector<256x128xbf16>, vector<128x128xbf16>, vector<256x128xf32> -> vector<256x128xf32>
    %c0_15 = arith.constant 0 : index
    %c0_16 = arith.constant 0 : index
    %19 = vector.load %arg7[%c0_15, %c0_16] : memref<1x128xf32, #tpu.memory_space<vmem>>, vector<1x128xf32>
    %20 = vector.broadcast %19 : vector<1x128xf32> to vector<256x128xf32>
    %21 = arith.addf %18, %20 : vector<256x128xf32>
    %cst_17 = arith.constant 0.000000e+00 : f32
    %22 = vector.broadcast %cst_17 : f32 to vector<256x128xf32>
    %23 = arith.maximumf %21, %22 : vector<256x128xf32>
    %24 = arith.truncf %23 : vector<256x128xf32> to vector<256x128xbf16>
    %c0_18 = arith.constant 0 : index
    %c0_19 = arith.constant 0 : index
    %25 = vector.load %arg8[%c0_18, %c0_19] : memref<128x128xbf16, #tpu.memory_space<vmem>>, vector<128x128xbf16>
    %cst_20 = arith.constant dense<0.000000e+00> : vector<256x128xf32>
    %26 = tpu.matmul %24, %25, %cst_20 {dimension_numbers = #tpu.dot_dimension_numbers<[1], [0], [0], [1], [0, 0, 1, 1], [], []>} : vector<256x128xbf16>, vector<128x128xbf16>, vector<256x128xf32> -> vector<256x128xf32>
    %c0_21 = arith.constant 0 : index
    %c0_22 = arith.constant 0 : index
    %27 = vector.load %arg9[%c0_21, %c0_22] : memref<1x128xf32, #tpu.memory_space<vmem>>, vector<1x128xf32>
    %28 = vector.broadcast %27 : vector<1x128xf32> to vector<256x128xf32>
    %29 = arith.addf %26, %28 : vector<256x128xf32>
    %cst_23 = arith.constant 0.000000e+00 : f32
    %30 = vector.broadcast %cst_23 : f32 to vector<256x128xf32>
    %31 = arith.maximumf %29, %30 : vector<256x128xf32>
    %32 = arith.truncf %31 : vector<256x128xf32> to vector<256x128xbf16>
    %c0_24 = arith.constant 0 : index
    %c0_25 = arith.constant 0 : index
    %33 = vector.load %arg10[%c0_24, %c0_25] : memref<128x128xbf16, #tpu.memory_space<vmem>>, vector<128x128xbf16>
    %cst_26 = arith.constant dense<0.000000e+00> : vector<256x128xf32>
    %34 = tpu.matmul %32, %33, %cst_26 {dimension_numbers = #tpu.dot_dimension_numbers<[1], [0], [0], [1], [0, 0, 1, 1], [], []>} : vector<256x128xbf16>, vector<128x128xbf16>, vector<256x128xf32> -> vector<256x128xf32>
    %35 = arith.truncf %34 : vector<256x128xf32> to vector<256x128xbf16>
    %c0_27 = arith.constant 0 : index
    %c0_28 = arith.constant 0 : index
    %36 = vector.load %arg11[%c0_27, %c0_28] : memref<256x128xbf16, #tpu.memory_space<vmem>>, vector<256x128xbf16>
    tpu.vector_store %arg11[%c0_27, %c0_28], %35 {strides = array<i32>} : memref<256x128xbf16, #tpu.memory_space<vmem>>, vector<256x128xbf16>,
    return
  }
  func.func @transform_0(%arg0: i32) -> (i32, i32) {
    %c0_i32 = arith.constant 0 : i32
    %c0_i32_0 = arith.constant 0 : i32
    return %arg0, %c0_i32 : i32, i32
  }
  func.func @transform_1(%arg0: i32) -> (i32, i32) {
    %c0_i32 = arith.constant 0 : i32
    %c0_i32_0 = arith.constant 0 : i32
    %c0_i32_1 = arith.constant 0 : i32
    return %c0_i32, %c0_i32_0 : i32, i32
  }
  func.func @transform_2(%arg0: i32) -> (i32, i32) {
    %c0_i32 = arith.constant 0 : i32
    %c0_i32_0 = arith.constant 0 : i32
    %c0_i32_1 = arith.constant 0 : i32
    return %c0_i32, %c0_i32_0 : i32, i32
  }
  func.func @transform_3(%arg0: i32) -> (i32, i32) {
    %c0_i32 = arith.constant 0 : i32
    %c0_i32_0 = arith.constant 0 : i32
    %c0_i32_1 = arith.constant 0 : i32
    return %c0_i32, %c0_i32_0 : i32, i32
  }
  func.func @transform_4(%arg0: i32) -> (i32, i32) {
    %c0_i32 = arith.constant 0 : i32
    %c0_i32_0 = arith.constant 0 : i32
    %c0_i32_1 = arith.constant 0 : i32
    return %c0_i32, %c0_i32_0 : i32, i32
  }
  func.func @transform_5(%arg0: i32) -> (i32, i32) {
    %c0_i32 = arith.constant 0 : i32
    %c0_i32_0 = arith.constant 0 : i32
    %c0_i32_1 = arith.constant 0 : i32
    return %c0_i32, %c0_i32_0 : i32, i32
  }
  func.func @transform_6(%arg0: i32) -> (i32, i32) {
    %c0_i32 = arith.constant 0 : i32
    %c0_i32_0 = arith.constant 0 : i32
    %c0_i32_1 = arith.constant 0 : i32
    return %c0_i32, %c0_i32_0 : i32, i32
  }
  func.func @transform_7(%arg0: i32) -> (i32, i32) {
    %c0_i32 = arith.constant 0 : i32
    %c0_i32_0 = arith.constant 0 : i32
    %c0_i32_1 = arith.constant 0 : i32
    return %c0_i32, %c0_i32_0 : i32, i32
  }
  func.func @transform_8(%arg0: i32) -> (i32, i32) {
    %c0_i32 = arith.constant 0 : i32
    %c0_i32_0 = arith.constant 0 : i32
    %c0_i32_1 = arith.constant 0 : i32
    return %c0_i32, %c0_i32_0 : i32, i32
  }
  func.func @transform_9(%arg0: i32) -> (i32, i32) {
    %c0_i32 = arith.constant 0 : i32
    %c0_i32_0 = arith.constant 0 : i32
    %c0_i32_1 = arith.constant 0 : i32
    return %c0_i32, %c0_i32_0 : i32, i32
  }
  func.func @transform_10(%arg0: i32) -> (i32, i32) {
    %c0_i32 = arith.constant 0 : i32
    %c0_i32_0 = arith.constant 0 : i32
    return %arg0, %c0_i32 : i32, i32
  }
}

</mosaic_0001>

<bundles_post_ra>
// kernel: _seasonality_forward_impl.1
= control target key start
LH: loop header
LB: loop body
LE: loop exit
PB: predicated region body
PF: predicated region fallthrough
CT: control target
= control target key end

     0   :  { %s2026_s1 = inlined_call_operand.vmem [shape: bf16[128,128], index: 1, kind: input, shape index: {}]   ;;  %s2027_s2 = inlined_call_operand.vmem [shape: f32[1,128], index: 2, kind: input, shape index: {}]   ;;  %s2028_s0 = inlined_call_operand.vmem [shape: bf16[256,128], index: 0, kind: input, shape index: {}]   ;;  %s2029_s3 = inlined_call_operand.vmem [shape: bf16[128,128], index: 3, kind: input, shape index: {}]   ;;  %s2030_s4 = inlined_call_operand.vmem [shape: f32[1,128], index: 4, kind: input, shape index: {}]   ;;  %s2031_s5 = inlined_call_operand.vmem [shape: bf16[128,128], index: 5, kind: input, shape index: {}]   ;;  %s2032_s6 = inlined_call_operand.vmem [shape: f32[1,128], index: 6, kind: input, shape index: {}]   ;;  %s2033_s7 = inlined_call_operand.vmem [shape: bf16[128,128], index: 7, kind: input, shape index: {}]   ;;  %s2034_s8 = inlined_call_operand.vmem [shape: f32[1,128], index: 8, kind: input, shape index: {}]   ;;  %s2035_s9 = inlined_call_operand.vmem [shape: bf16[128,128], index: 9, kind: input, shape index: {}]   ;;  %s2036_s10 = inlined_call_operand.vmem [shape: bf16[256,128], index: 10, kind: output, shape index: {}]  }
   0x1   :  { %v1451_v0 = vld [vmem:[%s2026_s1 + $0x38] sm:$0xff]  ;;  %v1450_v1 = vld [vmem:[%s2026_s1 + $0x30] sm:$0xff]  ;;  %v1449_v2 = vld [vmem:[%s2026_s1 + $0x28] sm:$0xff] }
   0x2   :  { %231 = vmatpush.bf16.msra.mxu0 %v1451_v0  ;;  %1579 = vmatpush.bf16.msra.mxu1 %v1451_v0  ;;  %v1448_v3 = vld [vmem:[%s2026_s1 + $0x20] sm:$0xff]  ;;  %v1447_v4 = vld [vmem:[%s2026_s1 + $0x18] sm:$0xff]  ;;  %v1446_v5 = vld [vmem:[%s2026_s1 + $0x10] sm:$0xff] }
   0x3   :  { %1580 = vmatpush.bf16.msra.mxu2 %v1451_v0  ;;  %1581 = vmatpush.bf16.msra.mxu3 %v1451_v0  ;;  %v1445_v6 = vld [vmem:[%s2026_s1 + $0x8] sm:$0xff]  ;;  %v1444_v7 = vld [vmem:[%s2026_s1] sm:$0xff]  ;;  %v1459_v11 = vld [vmem:[%s2029_s3 + $0x38] sm:$0xff] }
   0x4   :  { %v1428_v8 = vld [vmem:[%s2028_s0] sm:$0xff]  ;;  %v1429_v9 = vld [vmem:[%s2028_s0 + $0x8] sm:$0xff]  ;;  %v1458_v12 = vld [vmem:[%s2029_s3 + $0x30] sm:$0xff] }
   0x5   :  { %v1432_v10 = vld [vmem:[%s2028_s0 + $0x20] sm:$0xff]  ;;  %v1457_v13 = vld [vmem:[%s2029_s3 + $0x28] sm:$0xff]  ;;  %v1430_v15 = vld [vmem:[%s2028_s0 + $0x10] sm:$0xff] }
   0x6   :  { %232 = vmatpush.bf16.msra.mxu0 %v1450_v1  ;;  %1582 = vmatpush.bf16.msra.mxu1 %v1450_v1  ;;  %v1456_v14 = vld [vmem:[%s2029_s3 + $0x20] sm:$0xff]  ;;  %v1433_v16 = vld [vmem:[%s2028_s0 + $0x28] sm:$0xff]  ;;  %v1455_v17 = vld [vmem:[%s2029_s3 + $0x18] sm:$0xff] }
   0x7   :  { %1583 = vmatpush.bf16.msra.mxu2 %v1450_v1  ;;  %1584 = vmatpush.bf16.msra.mxu3 %v1450_v1  ;;  %v1436_v18 = vld [vmem:[%s2028_s0 + $0x40] sm:$0xff]  ;;  %v1454_v19 = vld [vmem:[%s2029_s3 + $0x10] sm:$0xff]  ;;  %v1453_v20 = vld [vmem:[%s2029_s3 + $0x8] sm:$0xff] }
   0x8   :  { %v1431_v21 = vld [vmem:[%s2028_s0 + $0x18] sm:$0xff]  ;;  %v1434_v22 = vld [vmem:[%s2028_s0 + $0x30] sm:$0xff]  ;;  %v1437_v24 = vld [vmem:[%s2028_s0 + $0x48] sm:$0xff] }
   0x9   :  { %v1435_v23 = vld [vmem:[%s2028_s0 + $0x38] sm:$0xff]  ;;  %v1452_v25 = vld [vmem:[%s2029_s3] sm:$0xff]  ;;  %v1438_v26 = vld [vmem:[%s2028_s0 + $0x50] sm:$0xff] }
   0xa   :  { %233 = vmatpush.bf16.msra.mxu0 %v1449_v2  ;;  %1585 = vmatpush.bf16.msra.mxu1 %v1449_v2  ;;  %v1746_v28 = vld [vmem:[%s2027_s2] ss:$0 sm:$0xff]  ;;  %v1439_v29 = vld [vmem:[%s2028_s0 + $0x58] sm:$0xff]  ;;  %v1441_v45 = vld [vmem:[%s2028_s0 + $0x68] sm:$0xff] }
   0xb   :  { %1586 = vmatpush.bf16.msra.mxu2 %v1449_v2  ;;  %1587 = vmatpush.bf16.msra.mxu3 %v1449_v2  ;;  %v1440_v37 = vld [vmem:[%s2028_s0 + $0x60] sm:$0xff]  ;;  %v1467_v53 = vld [vmem:[%s2031_s5 + $0x38] sm:$0xff]  ;;  %v1442_v55 = vld [vmem:[%s2028_s0 + $0x70] sm:$0xff] }
   0xc   :  { %v1466_v63 = vld [vmem:[%s2031_s5 + $0x30] sm:$0xff]  ;;  %v1443_v1 = vld [vmem:[%s2028_s0 + $0x78] sm:$0xff]  ;;  %v1465_v2 = vld [vmem:[%s2031_s5 + $0x28] sm:$0xff] }
   0xe   :  { %234 = vmatpush.bf16.msra.mxu0 %v1448_v3  ;;  %1588 = vmatpush.bf16.msra.mxu1 %v1448_v3 }
   0xf   :  { %1589 = vmatpush.bf16.msra.mxu2 %v1448_v3  ;;  %1590 = vmatpush.bf16.msra.mxu3 %v1448_v3 }
  0x12   :  { %235 = vmatpush.bf16.msra.mxu0 %v1447_v4  ;;  %1591 = vmatpush.bf16.msra.mxu1 %v1447_v4 }
  0x13   :  { %1592 = vmatpush.bf16.msra.mxu2 %v1447_v4  ;;  %1593 = vmatpush.bf16.msra.mxu3 %v1447_v4 }
  0x16   :  { %236 = vmatpush.bf16.msra.mxu0 %v1446_v5  ;;  %1594 = vmatpush.bf16.msra.mxu1 %v1446_v5 }
  0x17   :  { %1595 = vmatpush.bf16.msra.mxu2 %v1446_v5  ;;  %1596 = vmatpush.bf16.msra.mxu3 %v1446_v5 }
  0x1a   :  { %237 = vmatpush.bf16.msra.mxu0 %v1445_v6  ;;  %1597 = vmatpush.bf16.msra.mxu1 %v1445_v6 }
  0x1b   :  { %1598 = vmatpush.bf16.msra.mxu2 %v1445_v6  ;;  %1599 = vmatpush.bf16.msra.mxu3 %v1445_v6 }
  0x1e   :  { %238 = vmatpush.bf16.msra.mxu0 %v1444_v7  ;;  %1600 = vmatpush.bf16.msra.mxu1 %v1444_v7 }
  0x1f   :  { %1601 = vmatpush.bf16.msra.mxu2 %v1444_v7  ;;  %1602 = vmatpush.bf16.msra.mxu3 %v1444_v7 }
  0x21   :  { %239 = vmatmul.bf16.vlgmr.msra.gmra.mxu0 %v1428_v8  ;;  %259 = vmatmul.bf16.vlgmr.msra.gmra.mxu1 %v1432_v10  ;;  %v1463_v10 = vld [vmem:[%s2031_s5 + $0x18] sm:$0xff] }
  0x22   :  { %436 = vmatpush.bf16.msrb.mxu1 %v1459_v11  ;;  %279 = vmatmul.bf16.vlgmr.msra.gmra.mxu2 %v1436_v18  ;;  %v1462_v18 = vld [vmem:[%s2031_s5 + $0x10] sm:$0xff] }
  0x23   :  { %299 = vmatmul.bf16.vlgmr.msra.gmra.mxu3 %v1440_v37  ;;  %641 = vmatpush.bf16.msrb.mxu2 %v1467_v53 }
  0x26   :  { %437 = vmatpush.bf16.msrb.mxu1 %v1458_v12 }
  0x27   :  { %642 = vmatpush.bf16.msrb.mxu2 %v1466_v63 }
  0x2a   :  { %438 = vmatpush.bf16.msrb.mxu1 %v1457_v13 }
  0x2b   :  { %643 = vmatpush.bf16.msrb.mxu2 %v1465_v2 }
  0x2e   :  { %439 = vmatpush.bf16.msrb.mxu1 %v1456_v14 }
  0x31   :  { %244 = vmatmul.bf16.gmra.mxu0 %v1429_v9  ;;  %264 = vmatmul.bf16.gmra.mxu1 %v1433_v16  ;;  %v1464_v9 = vld [vmem:[%s2031_s5 + $0x20] sm:$0xff] }
  0x32   :  { %440 = vmatpush.bf16.msrb.mxu1 %v1455_v17  ;;  %284 = vmatmul.bf16.gmra.mxu2 %v1437_v24 }
  0x33   :  { %304 = vmatmul.bf16.gmra.mxu3 %v1441_v45  ;;  %644 = vmatpush.bf16.msrb.mxu2 %v1464_v9 }
  0x36   :  { %441 = vmatpush.bf16.msrb.mxu1 %v1454_v19  ;;  %v1461_v19 = vld [vmem:[%s2031_s5 + $0x8] sm:$0xff] }
  0x37   :  { %645 = vmatpush.bf16.msrb.mxu2 %v1463_v10 }
  0x3a   :  { %442 = vmatpush.bf16.msrb.mxu1 %v1453_v20 }
  0x3b   :  { %646 = vmatpush.bf16.msrb.mxu2 %v1462_v18 }
  0x3e   :  { %443 = vmatpush.bf16.msrb.mxu1 %v1452_v25 }
  0x3f   :  { %647 = vmatpush.bf16.msrb.mxu2 %v1461_v19 }
  0x41   :  { %249 = vmatmul.bf16.gmra.mxu0 %v1430_v15  ;;  %269 = vmatmul.bf16.gmra.mxu1 %v1434_v22 }
  0x42   :  { %289 = vmatmul.bf16.gmra.mxu2 %v1438_v26 }
  0x43   :  { %309 = vmatmul.bf16.gmra.mxu3 %v1442_v55 }
  0x51   :  { %254 = vmatmul.bf16.gmra.mxu0 %v1431_v21  ;;  %274 = vmatmul.bf16.gmra.mxu1 %v1435_v23 }
  0x52   :  { %294 = vmatmul.bf16.gmra.mxu2 %v1439_v29 }
  0x53   :  { %314 = vmatmul.bf16.gmra.mxu3 %v1443_v1 }
  0x9e   :  { %v240_v27 = vpop.f32.mrf.mxu0  ;;  %v260_v51 = vpop.f32.mrf.mxu1 }
  0x9f   :  { %v241_v30 = vadd.f32 %v1746_v28, %v240_v27  ;;  %v261_v3 = vadd.f32 %v1746_v28, %v260_v51  ;;  %v1460_v27 = vld [vmem:[%s2031_s5] sm:$0xff] }
  0xa0   :  { %648 = vmatpush.bf16.msrb.mxu2 %v1460_v27 }
  0xa1   :  { %v320_v33 = vmax.f32 %v241_v30, 0.0  ;;  %v328_v5 = vmax.f32 %v261_v3, 0.0 }
  0xa5   :  { %v280_v25 = vpop.f32.mrf.mxu2 }
  0xa6   :  { %v242_v31 = vpop.f32.mrf.mxu0  ;;  %v262_v56 = vpop.f32.mrf.mxu1  ;;  %v281_v37 = vadd.f32 %v1746_v28, %v280_v25 }
  0xa7   :  { %v243_v32 = vadd.f32 %v1746_v28, %v242_v31  ;;  %v263_v4 = vadd.f32 %v1746_v28, %v262_v56 }
  0xa9   :  { %v321_v34 = vmax.f32 %v243_v32, 0.0  ;;  %v329_v6 = vmax.f32 %v263_v4, 0.0 }
  0xab   :  { %v352_v35 = vpack.c.bf16 %v321_v34, %v320_v33  ;;  %v356_v8 = vpack.c.bf16 %v329_v6, %v328_v5 }
  0xad   :  { %444 = vmatmul.bf16.vlgmr.msrb.gmra.mxu1 %v352_v35  ;;  %v282_v32 = vpop.f32.mrf.mxu2 }
  0xae   :  { %v245_v36 = vpop.f32.mrf.mxu0  ;;  %v265_v0 = vpop.f32.mrf.mxu1 }
  0xaf   :  { %v246_v38 = vadd.f32 %v1746_v28, %v245_v36  ;;  %v266_v12 = vadd.f32 %v1746_v28, %v265_v0 }
  0xb1   :  { %v322_v41 = vmax.f32 %v246_v38, 0.0  ;;  %v330_v14 = vmax.f32 %v266_v12, 0.0  ;;  %v283_v38 = vadd.f32 %v1746_v28, %v282_v32 }
  0xb5   :  { %v285_v36 = vpop.f32.mrf.mxu2 }
  0xb6   :  { %v247_v39 = vpop.f32.mrf.mxu0  ;;  %v267_v7 = vpop.f32.mrf.mxu1 }
  0xb7   :  { %v248_v40 = vadd.f32 %v1746_v28, %v247_v39  ;;  %v268_v13 = vadd.f32 %v1746_v28, %v267_v7  ;;  %v336_v39 = vmax.f32 %v281_v37, 0.0  ;;  %v300_v7 = vpop.f32.mrf.mxu3 }
  0xb9   :  { %v323_v42 = vmax.f32 %v248_v40, 0.0  ;;  %v331_v15 = vmax.f32 %v268_v13, 0.0  ;;  %v337_v40 = vmax.f32 %v283_v38, 0.0  ;;  %v1475_v38 = vld [vmem:[%s2033_s7 + $0x38] sm:$0xff] }
  0xba   :  { %846 = vmatpush.bf16.msrb.mxu3 %v1475_v38  ;;  %v1869_v38 = vld [vmem:[%s2032_s6] ss:$0 sm:$0xff] }
  0xbb   :  { %v353_v43 = vpack.c.bf16 %v323_v42, %v322_v41  ;;  %v357_v16 = vpack.c.bf16 %v331_v15, %v330_v14 }
  0xbd   :  { %449 = vmatmul.bf16.gmra.mxu1 %v353_v43  ;;  %v287_v41 = vpop.f32.mrf.mxu2  ;;  %v360_v43 = vpack.c.bf16 %v337_v40, %v336_v39 }
  0xbe   :  { %v250_v44 = vpop.f32.mrf.mxu0  ;;  %v270_v11 = vpop.f32.mrf.mxu1 }
  0xbf   :  { %v251_v46 = vadd.f32 %v1746_v28, %v250_v44  ;;  %v271_v20 = vadd.f32 %v1746_v28, %v270_v11  ;;  %v1808_v44 = vld [vmem:[%s2030_s4] ss:$0 sm:$0xff]  ;;  %v302_v15 = vpop.f32.mrf.mxu3 }
  0xc0   :  { %v303_v27 = vadd.f32 %v1746_v28, %v302_v15 }
  0xc1   :  { %v324_v49 = vmax.f32 %v251_v46, 0.0  ;;  %v332_v23 = vmax.f32 %v271_v20, 0.0 }
  0xc6   :  { %v252_v47 = vpop.f32.mrf.mxu0  ;;  %v272_v17 = vpop.f32.mrf.mxu1 }
  0xc7   :  { %v253_v48 = vadd.f32 %v1746_v28, %v252_v47  ;;  %v273_v21 = vadd.f32 %v1746_v28, %v272_v17  ;;  %v290_v47 = vpop.f32.mrf.mxu2 }
  0xc9   :  { %v325_v50 = vmax.f32 %v253_v48, 0.0  ;;  %v333_v24 = vmax.f32 %v273_v21, 0.0  ;;  %v286_v48 = vadd.f32 %v1746_v28, %v285_v36 }
  0xcb   :  { %v354_v52 = vpack.c.bf16 %v325_v50, %v324_v49  ;;  %v358_v26 = vpack.c.bf16 %v333_v24, %v332_v23  ;;  %v288_v49 = vadd.f32 %v1746_v28, %v287_v41  ;;  %v338_v53 = vmax.f32 %v286_v48, 0.0  ;;  %v305_v23 = vpop.f32.mrf.mxu3  ;;  %v1474_v48 = vld [vmem:[%s2033_s7 + $0x30] sm:$0xff] }
  0xcc   :  { %847 = vmatpush.bf16.msrb.mxu3 %v1474_v48 }
  0xcd   :  { %454 = vmatmul.bf16.gmra.mxu1 %v354_v52 }
  0xce   :  { %v255_v54 = vpop.f32.mrf.mxu0  ;;  %v275_v22 = vpop.f32.mrf.mxu1 }
  0xcf   :  { %v256_v57 = vadd.f32 %v1746_v28, %v255_v54  ;;  %v276_v30 = vadd.f32 %v1746_v28, %v275_v22  ;;  %v339_v54 = vmax.f32 %v288_v49, 0.0 }
  0xd1   :  { %v326_v60 = vmax.f32 %v256_v57, 0.0  ;;  %v334_v33 = vmax.f32 %v276_v30, 0.0  ;;  %v361_v57 = vpack.c.bf16 %v339_v54, %v338_v53 }
  0xd6   :  { %v257_v58 = vpop.f32.mrf.mxu0  ;;  %v277_v29 = vpop.f32.mrf.mxu1 }
  0xd7   :  { %v258_v59 = vadd.f32 %v1746_v28, %v257_v58  ;;  %v278_v31 = vadd.f32 %v1746_v28, %v277_v29  ;;  %v292_v58 = vpop.f32.mrf.mxu2 }
  0xd9   :  { %v327_v61 = vmax.f32 %v258_v59, 0.0  ;;  %v335_v34 = vmax.f32 %v278_v31, 0.0 }
  0xdb   :  { %v355_v62 = vpack.c.bf16 %v327_v61, %v326_v60  ;;  %v359_v35 = vpack.c.bf16 %v335_v34, %v334_v33  ;;  %v291_v61 = vadd.f32 %v1746_v28, %v290_v47  ;;  %v345_v33 = vmax.f32 %v303_v27, 0.0 }
  0xdd   :  { %459 = vmatmul.bf16.gmra.mxu1 %v355_v62  ;;  %v293_v62 = vadd.f32 %v1746_v28, %v292_v58  ;;  %v340_v3 = vmax.f32 %v291_v61, 0.0 }
  0xdf   :  { %v295_v2 = vpop.f32.mrf.mxu2  ;;  %v341_v4 = vmax.f32 %v293_v62, 0.0 }
  0xe0   :  { %v296_v12 = vadd.f32 %v1746_v28, %v295_v2 }
  0xe2   :  { %v342_v18 = vmax.f32 %v296_v12, 0.0 }
  0xe7   :  { %v297_v9 = vpop.f32.mrf.mxu2 }
  0xe8   :  { %v298_v13 = vadd.f32 %v1746_v28, %v297_v9 }
  0xea   :  { %v343_v19 = vmax.f32 %v298_v13, 0.0 }
  0xec   :  { %v363_v22 = vpack.c.bf16 %v343_v19, %v342_v18  ;;  %v1470_v18 = vld [vmem:[%s2033_s7 + $0x10] sm:$0xff] }
  0xed   :  { %464 = vmatmul.bf16.gmra.mxu1 %v356_v8  ;;  %v362_v8 = vpack.c.bf16 %v341_v4, %v340_v3 }
  0xfd   :  { %469 = vmatmul.bf16.gmra.mxu1 %v357_v16 }
 0x10d   :  { %474 = vmatmul.bf16.gmra.mxu1 %v358_v26  ;;  %v301_v26 = vadd.f32 %v1746_v28, %v300_v7 }
 0x10f   :  { %v344_v32 = vmax.f32 %v301_v26, 0.0  ;;  %v1468_v26 = vld [vmem:[%s2033_s7] sm:$0xff] }
 0x111   :  { %v364_v37 = vpack.c.bf16 %v345_v33, %v344_v32 }
 0x11d   :  { %479 = vmatmul.bf16.gmra.mxu1 %v359_v35  ;;  %v307_v35 = vpop.f32.mrf.mxu3 }
 0x125   :  { %v310_v41 = vpop.f32.mrf.mxu3 }
 0x126   :  { %v311_v58 = vadd.f32 %v1746_v28, %v310_v41 }
 0x12a   :  { %v445_v42 = vpop.f32.mrf.mxu1 }
 0x12b   :  { %v446_v45 = vadd.f32 %v1808_v44, %v445_v42  ;;  %v306_v42 = vadd.f32 %v1746_v28, %v305_v23 }
 0x12d   :  { %484 = vmatmul.bf16.gmra.mxu1 %v360_v43  ;;  %v525_v51 = vmax.f32 %v446_v45, 0.0  ;;  %v308_v43 = vadd.f32 %v1746_v28, %v307_v35  ;;  %v346_v49 = vmax.f32 %v306_v42, 0.0  ;;  %v312_v54 = vpop.f32.mrf.mxu3 }
 0x132   :  { %v447_v46 = vpop.f32.mrf.mxu1 }
 0x133   :  { %v448_v50 = vadd.f32 %v1808_v44, %v447_v46 }
 0x135   :  { %v526_v52 = vmax.f32 %v448_v50, 0.0  ;;  %v347_v50 = vmax.f32 %v308_v43, 0.0 }
 0x137   :  { %v557_v55 = vpack.c.bf16 %v526_v52, %v525_v51  ;;  %v365_v53 = vpack.c.bf16 %v347_v50, %v346_v49 }
 0x139   :  { %649 = vmatmul.bf16.vlgmr.msrb.gmra.mxu2 %v557_v55  ;;  %v1473_v55 = vld [vmem:[%s2033_s7 + $0x28] sm:$0xff] }
 0x13a   :  { %v450_v56 = vpop.f32.mrf.mxu1  ;;  %848 = vmatpush.bf16.msrb.mxu3 %v1473_v55 }
 0x13b   :  { %v451_v59 = vadd.f32 %v1808_v44, %v450_v56 }
 0x13d   :  { %489 = vmatmul.bf16.gmra.mxu1 %v361_v57  ;;  %v527_v0 = vmax.f32 %v451_v59, 0.0  ;;  %v313_v59 = vadd.f32 %v1746_v28, %v312_v54 }
 0x13f   :  { %v349_v2 = vmax.f32 %v313_v59, 0.0 }
 0x142   :  { %v452_v60 = vpop.f32.mrf.mxu1 }
 0x143   :  { %v453_v63 = vadd.f32 %v1808_v44, %v452_v60 }
 0x145   :  { %v528_v1 = vmax.f32 %v453_v63, 0.0  ;;  %v1472_v63 = vld [vmem:[%s2033_s7 + $0x20] sm:$0xff] }
 0x146   :  { %849 = vmatpush.bf16.msrb.mxu3 %v1472_v63 }
 0x147   :  { %v558_v5 = vpack.c.bf16 %v528_v1, %v527_v0  ;;  %v315_v0 = vpop.f32.mrf.mxu3  ;;  %v348_v1 = vmax.f32 %v311_v58, 0.0 }
 0x149   :  { %654 = vmatmul.bf16.gmra.mxu2 %v558_v5  ;;  %v366_v5 = vpack.c.bf16 %v349_v2, %v348_v1 }
 0x14a   :  { %v455_v6 = vpop.f32.mrf.mxu1 }
 0x14b   :  { %v456_v10 = vadd.f32 %v1808_v44, %v455_v6  ;;  %v1471_v6 = vld [vmem:[%s2033_s7 + $0x18] sm:$0xff] }
 0x14c   :  { %850 = vmatpush.bf16.msrb.mxu3 %v1471_v6 }
 0x14d   :  { %494 = vmatmul.bf16.gmra.mxu1 %v362_v8  ;;  %v529_v16 = vmax.f32 %v456_v10, 0.0  ;;  %v316_v10 = vadd.f32 %v1746_v28, %v315_v0 }
 0x14f   :  { %v317_v7 = vpop.f32.mrf.mxu3  ;;  %v350_v15 = vmax.f32 %v316_v10, 0.0 }
 0x150   :  { %851 = vmatpush.bf16.msrb.mxu3 %v1470_v18 }
 0x152   :  { %v457_v11 = vpop.f32.mrf.mxu1 }
 0x153   :  { %v458_v14 = vadd.f32 %v1808_v44, %v457_v11  ;;  %v318_v11 = vadd.f32 %v1746_v28, %v317_v7  ;;  %v1469_v28 = vld [vmem:[%s2033_s7 + $0x8] sm:$0xff] }
 0x154   :  { %852 = vmatpush.bf16.msrb.mxu3 %v1469_v28 }
 0x155   :  { %v530_v17 = vmax.f32 %v458_v14, 0.0 }
 0x157   :  { %v559_v20 = vpack.c.bf16 %v530_v17, %v529_v16  ;;  %v351_v16 = vmax.f32 %v318_v11, 0.0 }
 0x158   :  { %853 = vmatpush.bf16.msrb.mxu3 %v1468_v26 }
 0x159   :  { %659 = vmatmul.bf16.gmra.mxu2 %v559_v20  ;;  %v367_v20 = vpack.c.bf16 %v351_v16, %v350_v15 }
 0x15a   :  { %v460_v21 = vpop.f32.mrf.mxu1 }
 0x15b   :  { %v461_v24 = vadd.f32 %v1808_v44, %v460_v21 }
 0x15d   :  { %499 = vmatmul.bf16.gmra.mxu1 %v363_v22  ;;  %v531_v30 = vmax.f32 %v461_v24, 0.0 }
 0x162   :  { %v462_v25 = vpop.f32.mrf.mxu1 }
 0x163   :  { %v463_v29 = vadd.f32 %v1808_v44, %v462_v25 }
 0x165   :  { %v532_v31 = vmax.f32 %v463_v29, 0.0 }
 0x167   :  { %v560_v34 = vpack.c.bf16 %v532_v31, %v531_v30 }
 0x169   :  { %664 = vmatmul.bf16.gmra.mxu2 %v560_v34 }
 0x16a   :  { %v465_v36 = vpop.f32.mrf.mxu1 }
 0x16b   :  { %v466_v39 = vadd.f32 %v1808_v44, %v465_v36 }
 0x16d   :  { %504 = vmatmul.bf16.gmra.mxu1 %v364_v37  ;;  %v533_v46 = vmax.f32 %v466_v39, 0.0 }
 0x172   :  { %v467_v40 = vpop.f32.mrf.mxu1 }
 0x173   :  { %v468_v45 = vadd.f32 %v1808_v44, %v467_v40 }
 0x175   :  { %v534_v47 = vmax.f32 %v468_v45, 0.0 }
 0x177   :  { %v561_v51 = vpack.c.bf16 %v534_v47, %v533_v46 }
 0x179   :  { %669 = vmatmul.bf16.gmra.mxu2 %v561_v51 }
 0x17a   :  { %v470_v52 = vpop.f32.mrf.mxu1 }
 0x17b   :  { %v471_v56 = vadd.f32 %v1808_v44, %v470_v52 }
 0x17d   :  { %509 = vmatmul.bf16.gmra.mxu1 %v365_v53  ;;  %v535_v61 = vmax.f32 %v471_v56, 0.0 }
 0x182   :  { %v472_v57 = vpop.f32.mrf.mxu1 }
 0x183   :  { %v473_v60 = vadd.f32 %v1808_v44, %v472_v57 }
 0x185   :  { %v536_v62 = vmax.f32 %v473_v60, 0.0 }
 0x187   :  { %v562_v3 = vpack.c.bf16 %v536_v62, %v535_v61 }
 0x189   :  { %674 = vmatmul.bf16.gmra.mxu2 %v562_v3 }
 0x18a   :  { %v475_v4 = vpop.f32.mrf.mxu1 }
 0x18b   :  { %v476_v8 = vadd.f32 %v1808_v44, %v475_v4 }
 0x18d   :  { %514 = vmatmul.bf16.gmra.mxu1 %v366_v5  ;;  %v537_v13 = vmax.f32 %v476_v8, 0.0 }
 0x192   :  { %v477_v9 = vpop.f32.mrf.mxu1 }
 0x193   :  { %v478_v12 = vadd.f32 %v1808_v44, %v477_v9 }
 0x195   :  { %v538_v14 = vmax.f32 %v478_v12, 0.0 }
 0x197   :  { %v563_v17 = vpack.c.bf16 %v538_v14, %v537_v13 }
 0x199   :  { %679 = vmatmul.bf16.gmra.mxu2 %v563_v17 }
 0x19a   :  { %v480_v19 = vpop.f32.mrf.mxu1 }
 0x19b   :  { %v481_v21 = vadd.f32 %v1808_v44, %v480_v19 }
 0x19d   :  { %519 = vmatmul.bf16.gmra.mxu1 %v367_v20  ;;  %v539_v24 = vmax.f32 %v481_v21, 0.0 }
 0x1a2   :  { %v482_v22 = vpop.f32.mrf.mxu1 }
 0x1a3   :  { %v483_v23 = vadd.f32 %v1808_v44, %v482_v22 }
 0x1a5   :  { %v540_v25 = vmax.f32 %v483_v23, 0.0 }
 0x1a7   :  { %v564_v27 = vpack.c.bf16 %v540_v25, %v539_v24 }
 0x1a9   :  { %684 = vmatmul.bf16.gmra.mxu2 %v564_v27 }
 0x1aa   :  { %v485_v29 = vpop.f32.mrf.mxu1 }
 0x1ab   :  { %v486_v30 = vadd.f32 %v1808_v44, %v485_v29 }
 0x1ad   :  { %v541_v33 = vmax.f32 %v486_v30, 0.0 }
 0x1b2   :  { %v487_v31 = vpop.f32.mrf.mxu1 }
 0x1b3   :  { %v488_v32 = vadd.f32 %v1808_v44, %v487_v31 }
 0x1b5   :  { %v542_v34 = vmax.f32 %v488_v32, 0.0  ;;  %v1483_v32 = vld [vmem:[%s2035_s9 + $0x38] sm:$0xff] }
 0x1b6   :  { %1047 = vmatpush.bf16.msrb.mxu0 %v1483_v32 }
 0x1b7   :  { %v565_v35 = vpack.c.bf16 %v542_v34, %v541_v33 }
 0x1b9   :  { %689 = vmatmul.bf16.gmra.mxu2 %v565_v35 }
 0x1ba   :  { %v490_v36 = vpop.f32.mrf.mxu1 }
 0x1bb   :  { %v491_v39 = vadd.f32 %v1808_v44, %v490_v36 }
 0x1bc   :  { %v650_v37 = vpop.f32.mrf.mxu2 }
 0x1bd   :  { %v651_v41 = vadd.f32 %v1869_v38, %v650_v37  ;;  %v543_v45 = vmax.f32 %v491_v39, 0.0 }
 0x1bf   :  { %v730_v48 = vmax.f32 %v651_v41, 0.0 }
 0x1c2   :  { %v492_v40 = vpop.f32.mrf.mxu1 }
 0x1c3   :  { %v493_v42 = vadd.f32 %v1808_v44, %v492_v40 }
 0x1c4   :  { %v652_v43 = vpop.f32.mrf.mxu2 }
 0x1c5   :  { %v544_v46 = vmax.f32 %v493_v42, 0.0  ;;  %v653_v47 = vadd.f32 %v1869_v38, %v652_v43 }
 0x1c7   :  { %v566_v49 = vpack.c.bf16 %v544_v46, %v543_v45  ;;  %v731_v50 = vmax.f32 %v653_v47, 0.0  ;;  %v1482_v46 = vld [vmem:[%s2035_s9 + $0x30] sm:$0xff] }
 0x1c8   :  { %1048 = vmatpush.bf16.msrb.mxu0 %v1482_v46 }
 0x1c9   :  { %694 = vmatmul.bf16.gmra.mxu2 %v566_v49  ;;  %v762_v51 = vpack.c.bf16 %v731_v50, %v730_v48  ;;  %v1481_v50 = vld [vmem:[%s2035_s9 + $0x28] sm:$0xff] }
 0x1ca   :  { %v495_v52 = vpop.f32.mrf.mxu1 }
 0x1cb   :  { %854 = vmatmul.bf16.vlgmr.msrb.gmra.mxu3 %v762_v51  ;;  %v496_v54 = vadd.f32 %v1808_v44, %v495_v52 }
 0x1cc   :  { %v655_v53 = vpop.f32.mrf.mxu2  ;;  %1049 = vmatpush.bf16.msrb.mxu0 %v1481_v50 }
 0x1cd   :  { %v656_v56 = vadd.f32 %v1869_v38, %v655_v53  ;;  %v545_v59 = vmax.f32 %v496_v54, 0.0 }
 0x1cf   :  { %v732_v62 = vmax.f32 %v656_v56, 0.0 }
 0x1d2   :  { %v497_v55 = vpop.f32.mrf.mxu1 }
 0x1d3   :  { %v498_v57 = vadd.f32 %v1808_v44, %v497_v55 }
 0x1d4   :  { %v657_v58 = vpop.f32.mrf.mxu2 }
 0x1d5   :  { %v546_v60 = vmax.f32 %v498_v57, 0.0  ;;  %v658_v61 = vadd.f32 %v1869_v38, %v657_v58 }
 0x1d7   :  { %v567_v63 = vpack.c.bf16 %v546_v60, %v545_v59  ;;  %v733_v0 = vmax.f32 %v658_v61, 0.0 }
 0x1d9   :  { %699 = vmatmul.bf16.gmra.mxu2 %v567_v63  ;;  %v763_v1 = vpack.c.bf16 %v733_v0, %v732_v62  ;;  %v1480_v62 = vld [vmem:[%s2035_s9 + $0x20] sm:$0xff] }
 0x1da   :  { %v500_v2 = vpop.f32.mrf.mxu1  ;;  %1050 = vmatpush.bf16.msrb.mxu0 %v1480_v62 }
 0x1db   :  { %859 = vmatmul.bf16.gmra.mxu3 %v763_v1  ;;  %v501_v4 = vadd.f32 %v1808_v44, %v500_v2  ;;  %v1479_v2 = vld [vmem:[%s2035_s9 + $0x18] sm:$0xff] }
 0x1dc   :  { %v660_v3 = vpop.f32.mrf.mxu2 }
 0x1dd   :  { %v661_v6 = vadd.f32 %v1869_v38, %v660_v3  ;;  %v547_v9 = vmax.f32 %v501_v4, 0.0 }
 0x1de   :  { %1051 = vmatpush.bf16.msrb.mxu0 %v1479_v2 }
 0x1df   :  { %v734_v12 = vmax.f32 %v661_v6, 0.0 }
 0x1e2   :  { %v502_v5 = vpop.f32.mrf.mxu1 }
 0x1e3   :  { %v503_v7 = vadd.f32 %v1808_v44, %v502_v5 }
 0x1e4   :  { %v662_v8 = vpop.f32.mrf.mxu2 }
 0x1e5   :  { %v548_v10 = vmax.f32 %v503_v7, 0.0  ;;  %v663_v11 = vadd.f32 %v1869_v38, %v662_v8 }
 0x1e7   :  { %v568_v13 = vpack.c.bf16 %v548_v10, %v547_v9  ;;  %v735_v14 = vmax.f32 %v663_v11, 0.0 }
 0x1e9   :  { %704 = vmatmul.bf16.gmra.mxu2 %v568_v13  ;;  %v764_v15 = vpack.c.bf16 %v735_v14, %v734_v12 }
 0x1ea   :  { %v505_v16 = vpop.f32.mrf.mxu1 }
 0x1eb   :  { %864 = vmatmul.bf16.gmra.mxu3 %v764_v15  ;;  %v506_v18 = vadd.f32 %v1808_v44, %v505_v16  ;;  %v1478_v15 = vld [vmem:[%s2035_s9 + $0x10] sm:$0xff] }
 0x1ec   :  { %v665_v17 = vpop.f32.mrf.mxu2  ;;  %1052 = vmatpush.bf16.msrb.mxu0 %v1478_v15 }
 0x1ed   :  { %v666_v20 = vadd.f32 %v1869_v38, %v665_v17  ;;  %v549_v22 = vmax.f32 %v506_v18, 0.0 }
 0x1ef   :  { %v736_v25 = vmax.f32 %v666_v20, 0.0 }
 0x1f2   :  { %v507_v19 = vpop.f32.mrf.mxu1 }
 0x1f3   :  { %v508_v28 = vadd.f32 %v1808_v44, %v507_v19 }
 0x1f4   :  { %v667_v21 = vpop.f32.mrf.mxu2 }
 0x1f5   :  { %v550_v23 = vmax.f32 %v508_v28, 0.0  ;;  %v668_v24 = vadd.f32 %v1869_v38, %v667_v21  ;;  %v1476_v21 = vld [vmem:[%s2035_s9] sm:$0xff] }
 0x1f7   :  { %v569_v26 = vpack.c.bf16 %v550_v23, %v549_v22  ;;  %v737_v27 = vmax.f32 %v668_v24, 0.0 }
 0x1f9   :  { %709 = vmatmul.bf16.gmra.mxu2 %v569_v26  ;;  %v765_v29 = vpack.c.bf16 %v737_v27, %v736_v25 }
 0x1fa   :  { %v510_v30 = vpop.f32.mrf.mxu1 }
 0x1fb   :  { %869 = vmatmul.bf16.gmra.mxu3 %v765_v29  ;;  %v511_v33 = vadd.f32 %v1808_v44, %v510_v30 }
 0x1fc   :  { %v670_v31 = vpop.f32.mrf.mxu2 }
 0x1fd   :  { %v671_v35 = vadd.f32 %v1869_v38, %v670_v31  ;;  %v551_v39 = vmax.f32 %v511_v33, 0.0  ;;  %v1930_v33 = vld [vmem:[%s2034_s8] ss:$0 sm:$0xff] }
 0x1ff   :  { %v738_v42 = vmax.f32 %v671_v35, 0.0 }
 0x202   :  { %v512_v34 = vpop.f32.mrf.mxu1 }
 0x203   :  { %v513_v36 = vadd.f32 %v1808_v44, %v512_v34 }
 0x204   :  { %v672_v37 = vpop.f32.mrf.mxu2 }
 0x205   :  { %v552_v40 = vmax.f32 %v513_v36, 0.0  ;;  %v673_v41 = vadd.f32 %v1869_v38, %v672_v37 }
 0x207   :  { %v570_v43 = vpack.c.bf16 %v552_v40, %v551_v39  ;;  %v739_v45 = vmax.f32 %v673_v41, 0.0 }
 0x209   :  { %714 = vmatmul.bf16.gmra.mxu2 %v570_v43  ;;  %v766_v47 = vpack.c.bf16 %v739_v45, %v738_v42 }
 0x20a   :  { %v515_v48 = vpop.f32.mrf.mxu1 }
 0x20b   :  { %874 = vmatmul.bf16.gmra.mxu3 %v766_v47  ;;  %v516_v51 = vadd.f32 %v1808_v44, %v515_v48 }
 0x20c   :  { %v675_v49 = vpop.f32.mrf.mxu2 }
 0x20d   :  { %v676_v53 = vadd.f32 %v1869_v38, %v675_v49  ;;  %v553_v56 = vmax.f32 %v516_v51, 0.0 }
 0x20f   :  { %v740_v59 = vmax.f32 %v676_v53, 0.0 }
 0x212   :  { %v517_v52 = vpop.f32.mrf.mxu1 }
 0x213   :  { %v518_v54 = vadd.f32 %v1808_v44, %v517_v52 }
 0x214   :  { %v677_v55 = vpop.f32.mrf.mxu2 }
 0x215   :  { %v554_v57 = vmax.f32 %v518_v54, 0.0  ;;  %v678_v58 = vadd.f32 %v1869_v38, %v677_v55 }
 0x217   :  { %v571_v60 = vpack.c.bf16 %v554_v57, %v553_v56  ;;  %v741_v61 = vmax.f32 %v678_v58, 0.0 }
 0x219   :  { %719 = vmatmul.bf16.gmra.mxu2 %v571_v60  ;;  %v767_v63 = vpack.c.bf16 %v741_v61, %v740_v59 }
 0x21a   :  { %v520_v0 = vpop.f32.mrf.mxu1 }
 0x21b   :  { %879 = vmatmul.bf16.gmra.mxu3 %v767_v63  ;;  %v521_v3 = vadd.f32 %v1808_v44, %v520_v0 }
 0x21c   :  { %v680_v1 = vpop.f32.mrf.mxu2 }
 0x21d   :  { %v681_v5 = vadd.f32 %v1869_v38, %v680_v1  ;;  %v555_v8 = vmax.f32 %v521_v3, 0.0 }
 0x21f   :  { %v742_v11 = vmax.f32 %v681_v5, 0.0 }
 0x222   :  { %v522_v4 = vpop.f32.mrf.mxu1 }
 0x223   :  { %v523_v6 = vadd.f32 %v1808_v44, %v522_v4  ;;  %v1477_v44 = vld [vmem:[%s2035_s9 + $0x8] sm:$0xff] }
 0x224   :  { %v682_v7 = vpop.f32.mrf.mxu2  ;;  %1053 = vmatpush.bf16.msrb.mxu0 %v1477_v44 }
 0x225   :  { %v556_v9 = vmax.f32 %v523_v6, 0.0  ;;  %v683_v10 = vadd.f32 %v1869_v38, %v682_v7 }
 0x227   :  { %v572_v12 = vpack.c.bf16 %v556_v9, %v555_v8  ;;  %v743_v13 = vmax.f32 %v683_v10, 0.0 }
 0x228   :  { %1054 = vmatpush.bf16.msrb.mxu0 %v1476_v21 }
 0x229   :  { %724 = vmatmul.bf16.gmra.mxu2 %v572_v12  ;;  %v768_v14 = vpack.c.bf16 %v743_v13, %v742_v11 }
 0x22b   :  { %884 = vmatmul.bf16.gmra.mxu3 %v768_v14 }
 0x22c   :  { %v685_v16 = vpop.f32.mrf.mxu2 }
 0x22d   :  { %v686_v17 = vadd.f32 %v1869_v38, %v685_v16 }
 0x22f   :  { %v744_v20 = vmax.f32 %v686_v17, 0.0 }
 0x234   :  { %v687_v18 = vpop.f32.mrf.mxu2 }
 0x235   :  { %v688_v19 = vadd.f32 %v1869_v38, %v687_v18 }
 0x237   :  { %v745_v28 = vmax.f32 %v688_v19, 0.0 }
 0x239   :  { %v769_v22 = vpack.c.bf16 %v745_v28, %v744_v20 }
 0x23b   :  { %889 = vmatmul.bf16.gmra.mxu3 %v769_v22 }
 0x23c   :  { %v690_v23 = vpop.f32.mrf.mxu2 }
 0x23d   :  { %v691_v24 = vadd.f32 %v1869_v38, %v690_v23 }
 0x23f   :  { %v746_v27 = vmax.f32 %v691_v24, 0.0 }
 0x244   :  { %v692_v25 = vpop.f32.mrf.mxu2 }
 0x245   :  { %v693_v26 = vadd.f32 %v1869_v38, %v692_v25 }
 0x247   :  { %v747_v29 = vmax.f32 %v693_v26, 0.0 }
 0x249   :  { %v770_v30 = vpack.c.bf16 %v747_v29, %v746_v27 }
 0x24b   :  { %894 = vmatmul.bf16.gmra.mxu3 %v770_v30 }
 0x24c   :  { %v695_v31 = vpop.f32.mrf.mxu2 }
 0x24d   :  { %v696_v34 = vadd.f32 %v1869_v38, %v695_v31 }
 0x24e   :  { %v855_v32 = vpop.f32.mrf.mxu3 }
 0x24f   :  { %v856_v36 = vadd.f32 %v1930_v33, %v855_v32  ;;  %v748_v40 = vmax.f32 %v696_v34, 0.0 }
 0x251   :  { %v935_v43 = vmax.f32 %v856_v36, 0.0 }
 0x254   :  { %v697_v35 = vpop.f32.mrf.mxu2 }
 0x255   :  { %v698_v37 = vadd.f32 %v1869_v38, %v697_v35 }
 0x256   :  { %v857_v39 = vpop.f32.mrf.mxu3 }
 0x257   :  { %v749_v41 = vmax.f32 %v698_v37, 0.0  ;;  %v858_v42 = vadd.f32 %v1930_v33, %v857_v39 }
 0x259   :  { %v771_v45 = vpack.c.bf16 %v749_v41, %v748_v40  ;;  %v936_v46 = vmax.f32 %v858_v42, 0.0 }
 0x25b   :  { %899 = vmatmul.bf16.gmra.mxu3 %v771_v45  ;;  %v967_v47 = vpack.c.bf16 %v936_v46, %v935_v43 }
 0x25c   :  { %v700_v48 = vpop.f32.mrf.mxu2 }
 0x25d   :  { %1055 = vmatmul.bf16.vlgmr.msrb.gmra.mxu0 %v967_v47  ;;  %v701_v50 = vadd.f32 %v1869_v38, %v700_v48 }
 0x25e   :  { %v860_v49 = vpop.f32.mrf.mxu3 }
 0x25f   :  { %v861_v52 = vadd.f32 %v1930_v33, %v860_v49  ;;  %v750_v55 = vmax.f32 %v701_v50, 0.0 }
 0x261   :  { %v937_v58 = vmax.f32 %v861_v52, 0.0 }
 0x264   :  { %v702_v51 = vpop.f32.mrf.mxu2 }
 0x265   :  { %v703_v53 = vadd.f32 %v1869_v38, %v702_v51 }
 0x266   :  { %v862_v54 = vpop.f32.mrf.mxu3 }
 0x267   :  { %v751_v56 = vmax.f32 %v703_v53, 0.0  ;;  %v863_v57 = vadd.f32 %v1930_v33, %v862_v54 }
 0x269   :  { %v772_v59 = vpack.c.bf16 %v751_v56, %v750_v55  ;;  %v938_v60 = vmax.f32 %v863_v57, 0.0 }
 0x26b   :  { %904 = vmatmul.bf16.gmra.mxu3 %v772_v59  ;;  %v968_v61 = vpack.c.bf16 %v938_v60, %v937_v58 }
 0x26c   :  { %v705_v62 = vpop.f32.mrf.mxu2 }
 0x26d   :  { %1060 = vmatmul.bf16.gmra.mxu0 %v968_v61  ;;  %v706_v0 = vadd.f32 %v1869_v38, %v705_v62 }
 0x26e   :  { %v865_v63 = vpop.f32.mrf.mxu3 }
 0x26f   :  { %v866_v2 = vadd.f32 %v1930_v33, %v865_v63  ;;  %v752_v5 = vmax.f32 %v706_v0, 0.0 }
 0x271   :  { %v939_v8 = vmax.f32 %v866_v2, 0.0 }
 0x274   :  { %v707_v1 = vpop.f32.mrf.mxu2 }
 0x275   :  { %v708_v3 = vadd.f32 %v1869_v38, %v707_v1 }
 0x276   :  { %v867_v4 = vpop.f32.mrf.mxu3 }
 0x277   :  { %v753_v6 = vmax.f32 %v708_v3, 0.0  ;;  %v868_v7 = vadd.f32 %v1930_v33, %v867_v4 }
 0x279   :  { %v773_v9 = vpack.c.bf16 %v753_v6, %v752_v5  ;;  %v940_v10 = vmax.f32 %v868_v7, 0.0 }
 0x27b   :  { %909 = vmatmul.bf16.gmra.mxu3 %v773_v9  ;;  %v969_v11 = vpack.c.bf16 %v940_v10, %v939_v8 }
 0x27c   :  { %v710_v12 = vpop.f32.mrf.mxu2 }
 0x27d   :  { %1065 = vmatmul.bf16.gmra.mxu0 %v969_v11  ;;  %v711_v14 = vadd.f32 %v1869_v38, %v710_v12 }
 0x27e   :  { %v870_v13 = vpop.f32.mrf.mxu3 }
 0x27f   :  { %v871_v16 = vadd.f32 %v1930_v33, %v870_v13  ;;  %v754_v18 = vmax.f32 %v711_v14, 0.0 }
 0x281   :  { %v941_v28 = vmax.f32 %v871_v16, 0.0 }
 0x284   :  { %v712_v15 = vpop.f32.mrf.mxu2 }
 0x285   :  { %v713_v44 = vadd.f32 %v1869_v38, %v712_v15 }
 0x286   :  { %v872_v17 = vpop.f32.mrf.mxu3 }
 0x287   :  { %v755_v19 = vmax.f32 %v713_v44, 0.0  ;;  %v873_v20 = vadd.f32 %v1930_v33, %v872_v17 }
 0x289   :  { %v774_v21 = vpack.c.bf16 %v755_v19, %v754_v18  ;;  %v942_v22 = vmax.f32 %v873_v20, 0.0 }
 0x28b   :  { %914 = vmatmul.bf16.gmra.mxu3 %v774_v21  ;;  %v970_v23 = vpack.c.bf16 %v942_v22, %v941_v28 }
 0x28c   :  { %v715_v24 = vpop.f32.mrf.mxu2 }
 0x28d   :  { %1070 = vmatmul.bf16.gmra.mxu0 %v970_v23  ;;  %v716_v26 = vadd.f32 %v1869_v38, %v715_v24 }
 0x28e   :  { %v875_v25 = vpop.f32.mrf.mxu3 }
 0x28f   :  { %v876_v29 = vadd.f32 %v1930_v33, %v875_v25  ;;  %v756_v32 = vmax.f32 %v716_v26, 0.0 }
 0x291   :  { %v943_v36 = vmax.f32 %v876_v29, 0.0 }
 0x294   :  { %v717_v27 = vpop.f32.mrf.mxu2 }
 0x295   :  { %v718_v30 = vadd.f32 %v1869_v38, %v717_v27 }
 0x296   :  { %v877_v31 = vpop.f32.mrf.mxu3 }
 0x297   :  { %v757_v34 = vmax.f32 %v718_v30, 0.0  ;;  %v878_v35 = vadd.f32 %v1930_v33, %v877_v31 }
 0x299   :  { %v775_v37 = vpack.c.bf16 %v757_v34, %v756_v32  ;;  %v944_v39 = vmax.f32 %v878_v35, 0.0 }
 0x29b   :  { %919 = vmatmul.bf16.gmra.mxu3 %v775_v37  ;;  %v971_v40 = vpack.c.bf16 %v944_v39, %v943_v36 }
 0x29c   :  { %v720_v41 = vpop.f32.mrf.mxu2 }
 0x29d   :  { %1075 = vmatmul.bf16.gmra.mxu0 %v971_v40  ;;  %v721_v43 = vadd.f32 %v1869_v38, %v720_v41 }
 0x29e   :  { %v880_v42 = vpop.f32.mrf.mxu3 }
 0x29f   :  { %v881_v46 = vadd.f32 %v1930_v33, %v880_v42  ;;  %v758_v49 = vmax.f32 %v721_v43, 0.0 }
 0x2a1   :  { %v945_v52 = vmax.f32 %v881_v46, 0.0 }
 0x2a4   :  { %v722_v45 = vpop.f32.mrf.mxu2 }
 0x2a5   :  { %v723_v47 = vadd.f32 %v1869_v38, %v722_v45 }
 0x2a6   :  { %v882_v48 = vpop.f32.mrf.mxu3 }
 0x2a7   :  { %v759_v50 = vmax.f32 %v723_v47, 0.0  ;;  %v883_v51 = vadd.f32 %v1930_v33, %v882_v48 }
 0x2a9   :  { %v776_v53 = vpack.c.bf16 %v759_v50, %v758_v49  ;;  %v946_v54 = vmax.f32 %v883_v51, 0.0 }
 0x2ab   :  { %924 = vmatmul.bf16.gmra.mxu3 %v776_v53  ;;  %v972_v55 = vpack.c.bf16 %v946_v54, %v945_v52 }
 0x2ac   :  { %v725_v56 = vpop.f32.mrf.mxu2 }
 0x2ad   :  { %1080 = vmatmul.bf16.gmra.mxu0 %v972_v55  ;;  %v726_v58 = vadd.f32 %v1869_v38, %v725_v56 }
 0x2ae   :  { %v885_v57 = vpop.f32.mrf.mxu3 }
 0x2af   :  { %v886_v60 = vadd.f32 %v1930_v33, %v885_v57  ;;  %v760_v63 = vmax.f32 %v726_v58, 0.0 }
 0x2b1   :  { %v947_v2 = vmax.f32 %v886_v60, 0.0 }
 0x2b4   :  { %v727_v59 = vpop.f32.mrf.mxu2 }
 0x2b5   :  { %v728_v61 = vadd.f32 %v1869_v38, %v727_v59 }
 0x2b6   :  { %v887_v62 = vpop.f32.mrf.mxu3 }
 0x2b7   :  { %v761_v0 = vmax.f32 %v728_v61, 0.0  ;;  %v888_v1 = vadd.f32 %v1930_v33, %v887_v62 }
 0x2b9   :  { %v777_v3 = vpack.c.bf16 %v761_v0, %v760_v63  ;;  %v948_v4 = vmax.f32 %v888_v1, 0.0 }
 0x2bb   :  { %929 = vmatmul.bf16.gmra.mxu3 %v777_v3  ;;  %v973_v5 = vpack.c.bf16 %v948_v4, %v947_v2 }
 0x2bd   :  { %1085 = vmatmul.bf16.gmra.mxu0 %v973_v5 }
 0x2be   :  { %v890_v6 = vpop.f32.mrf.mxu3 }
 0x2bf   :  { %v891_v7 = vadd.f32 %v1930_v33, %v890_v6 }
 0x2c1   :  { %v949_v10 = vmax.f32 %v891_v7, 0.0 }
 0x2c6   :  { %v892_v8 = vpop.f32.mrf.mxu3 }
 0x2c7   :  { %v893_v9 = vadd.f32 %v1930_v33, %v892_v8 }
 0x2c9   :  { %v950_v11 = vmax.f32 %v893_v9, 0.0 }
 0x2cb   :  { %v974_v38 = vpack.c.bf16 %v950_v11, %v949_v10 }
 0x2cd   :  { %1090 = vmatmul.bf16.gmra.mxu0 %v974_v38 }
 0x2ce   :  { %v895_v12 = vpop.f32.mrf.mxu3 }
 0x2cf   :  { %v896_v13 = vadd.f32 %v1930_v33, %v895_v12 }
 0x2d1   :  { %v951_v16 = vmax.f32 %v896_v13, 0.0 }
 0x2d6   :  { %v897_v14 = vpop.f32.mrf.mxu3 }
 0x2d7   :  { %v898_v15 = vadd.f32 %v1930_v33, %v897_v14 }
 0x2d9   :  { %v952_v44 = vmax.f32 %v898_v15, 0.0 }
 0x2da   :  { %v1056_v17 = vpop.f32.mrf.mxu0 }
 0x2db   :  { %v975_v18 = vpack.c.bf16 %v952_v44, %v951_v16 }
 0x2dd   :  { %1095 = vmatmul.bf16.gmra.mxu0 %v975_v18 }
 0x2de   :  { %v900_v19 = vpop.f32.mrf.mxu3 }
 0x2df   :  { %v901_v21 = vadd.f32 %v1930_v33, %v900_v19 }
 0x2e1   :  { %v953_v24 = vmax.f32 %v901_v21, 0.0 }
 0x2e2   :  { %v1058_v20 = vpop.f32.mrf.mxu0 }
 0x2e3   :  { %v1487_v28 = vpack.c.bf16 %v1058_v20, %v1056_v17 }
 0x2e5   :  { %1488 = vst [vmem:[%s2036_s10] sm:$0xff] %v1487_v28  }
 0x2e6   :  { %v902_v22 = vpop.f32.mrf.mxu3 }
 0x2e7   :  { %v903_v23 = vadd.f32 %v1930_v33, %v902_v22 }
 0x2e9   :  { %v954_v25 = vmax.f32 %v903_v23, 0.0 }
 0x2ea   :  { %v1061_v26 = vpop.f32.mrf.mxu0 }
 0x2eb   :  { %v976_v27 = vpack.c.bf16 %v954_v25, %v953_v24 }
 0x2ed   :  { %1100 = vmatmul.bf16.gmra.mxu0 %v976_v27 }
 0x2ee   :  { %v905_v29 = vpop.f32.mrf.mxu3 }
 0x2ef   :  { %v906_v32 = vadd.f32 %v1930_v33, %v905_v29 }
 0x2f1   :  { %v955_v36 = vmax.f32 %v906_v32, 0.0 }
 0x2f2   :  { %v1063_v30 = vpop.f32.mrf.mxu0 }
 0x2f3   :  { %v1492_v31 = vpack.c.bf16 %v1063_v30, %v1061_v26 }
 0x2f5   :  { %1564 = vst [vmem:[%s2036_s10 + $0x8] sm:$0xff] %v1492_v31  }
 0x2f6   :  { %v907_v34 = vpop.f32.mrf.mxu3 }
 0x2f7   :  { %v908_v35 = vadd.f32 %v1930_v33, %v907_v34 }
 0x2f9   :  { %v956_v37 = vmax.f32 %v908_v35, 0.0 }
 0x2fa   :  { %v1066_v39 = vpop.f32.mrf.mxu0 }
 0x2fb   :  { %v977_v40 = vpack.c.bf16 %v956_v37, %v955_v36 }
 0x2fd   :  { %1105 = vmatmul.bf16.gmra.mxu0 %v977_v40 }
 0x2fe   :  { %v910_v41 = vpop.f32.mrf.mxu3 }
 0x2ff   :  { %v911_v45 = vadd.f32 %v1930_v33, %v910_v41 }
 0x301   :  { %v957_v48 = vmax.f32 %v911_v45, 0.0 }
 0x302   :  { %v1068_v42 = vpop.f32.mrf.mxu0 }
 0x303   :  { %v1497_v43 = vpack.c.bf16 %v1068_v42, %v1066_v39 }
 0x305   :  { %1565 = vst [vmem:[%s2036_s10 + $0x10] sm:$0xff] %v1497_v43  }
 0x306   :  { %v912_v46 = vpop.f32.mrf.mxu3 }
 0x307   :  { %v913_v47 = vadd.f32 %v1930_v33, %v912_v46 }
 0x309   :  { %v958_v49 = vmax.f32 %v913_v47, 0.0 }
 0x30a   :  { %v1071_v50 = vpop.f32.mrf.mxu0 }
 0x30b   :  { %v978_v51 = vpack.c.bf16 %v958_v49, %v957_v48 }
 0x30d   :  { %1110 = vmatmul.bf16.gmra.mxu0 %v978_v51 }
 0x30e   :  { %v915_v52 = vpop.f32.mrf.mxu3 }
 0x30f   :  { %v916_v55 = vadd.f32 %v1930_v33, %v915_v52 }
 0x311   :  { %v959_v58 = vmax.f32 %v916_v55, 0.0 }
 0x312   :  { %v1073_v53 = vpop.f32.mrf.mxu0 }
 0x313   :  { %v1502_v54 = vpack.c.bf16 %v1073_v53, %v1071_v50 }
 0x315   :  { %1566 = vst [vmem:[%s2036_s10 + $0x18] sm:$0xff] %v1502_v54  }
 0x316   :  { %v917_v56 = vpop.f32.mrf.mxu3 }
 0x317   :  { %v918_v57 = vadd.f32 %v1930_v33, %v917_v56 }
 0x319   :  { %v960_v59 = vmax.f32 %v918_v57, 0.0 }
 0x31a   :  { %v1076_v60 = vpop.f32.mrf.mxu0 }
 0x31b   :  { %v979_v61 = vpack.c.bf16 %v960_v59, %v959_v58 }
 0x31d   :  { %1115 = vmatmul.bf16.gmra.mxu0 %v979_v61 }
 0x31e   :  { %v920_v62 = vpop.f32.mrf.mxu3 }
 0x31f   :  { %v921_v1 = vadd.f32 %v1930_v33, %v920_v62 }
 0x321   :  { %v961_v4 = vmax.f32 %v921_v1, 0.0 }
 0x322   :  { %v1078_v63 = vpop.f32.mrf.mxu0 }
 0x323   :  { %v1507_v0 = vpack.c.bf16 %v1078_v63, %v1076_v60 }
 0x325   :  { %1567 = vst [vmem:[%s2036_s10 + $0x20] sm:$0xff] %v1507_v0  }
 0x326   :  { %v922_v2 = vpop.f32.mrf.mxu3 }
 0x327   :  { %v923_v3 = vadd.f32 %v1930_v33, %v922_v2 }
 0x329   :  { %v962_v5 = vmax.f32 %v923_v3, 0.0 }
 0x32a   :  { %v1081_v6 = vpop.f32.mrf.mxu0 }
 0x32b   :  { %v980_v7 = vpack.c.bf16 %v962_v5, %v961_v4 }
 0x32d   :  { %1120 = vmatmul.bf16.gmra.mxu0 %v980_v7 }
 0x32e   :  { %v925_v8 = vpop.f32.mrf.mxu3 }
 0x32f   :  { %v926_v11 = vadd.f32 %v1930_v33, %v925_v8 }
 0x331   :  { %v963_v13 = vmax.f32 %v926_v11, 0.0 }
 0x332   :  { %v1083_v9 = vpop.f32.mrf.mxu0 }
 0x333   :  { %v1512_v10 = vpack.c.bf16 %v1083_v9, %v1081_v6 }
 0x335   :  { %1568 = vst [vmem:[%s2036_s10 + $0x28] sm:$0xff] %v1512_v10  }
 0x336   :  { %v927_v38 = vpop.f32.mrf.mxu3 }
 0x337   :  { %v928_v12 = vadd.f32 %v1930_v33, %v927_v38 }
 0x339   :  { %v964_v14 = vmax.f32 %v928_v12, 0.0 }
 0x33a   :  { %v1086_v15 = vpop.f32.mrf.mxu0 }
 0x33b   :  { %v981_v16 = vpack.c.bf16 %v964_v14, %v963_v13 }
 0x33d   :  { %1125 = vmatmul.bf16.gmra.mxu0 %v981_v16 }
 0x33e   :  { %v930_v44 = vpop.f32.mrf.mxu3 }
 0x33f   :  { %v931_v19 = vadd.f32 %v1930_v33, %v930_v44 }
 0x341   :  { %v965_v21 = vmax.f32 %v931_v19, 0.0 }
 0x342   :  { %v1088_v17 = vpop.f32.mrf.mxu0 }
 0x343   :  { %v1517_v18 = vpack.c.bf16 %v1088_v17, %v1086_v15 }
 0x345   :  { %1569 = vst [vmem:[%s2036_s10 + $0x30] sm:$0xff] %v1517_v18  }
 0x346   :  { %v932_v20 = vpop.f32.mrf.mxu3 }
 0x347   :  { %v933_v28 = vadd.f32 %v1930_v33, %v932_v20 }
 0x349   :  { %v966_v22 = vmax.f32 %v933_v28, 0.0 }
 0x34a   :  { %v1091_v23 = vpop.f32.mrf.mxu0 }
 0x34b   :  { %v982_v24 = vpack.c.bf16 %v966_v22, %v965_v21 }
 0x34d   :  { %1130 = vmatmul.bf16.gmra.mxu0 %v982_v24 }
 0x352   :  { %v1093_v25 = vpop.f32.mrf.mxu0 }
 0x353   :  { %v1522_v26 = vpack.c.bf16 %v1093_v25, %v1091_v23 }
 0x355   :  { %1570 = vst [vmem:[%s2036_s10 + $0x38] sm:$0xff] %v1522_v26  }
 0x35a   :  { %v1096_v27 = vpop.f32.mrf.mxu0 }
 0x362   :  { %v1098_v29 = vpop.f32.mrf.mxu0 }
 0x363   :  { %v1527_v30 = vpack.c.bf16 %v1098_v29, %v1096_v27 }
 0x365   :  { %1571 = vst [vmem:[%s2036_s10 + $0x40] sm:$0xff] %v1527_v30  }
 0x36a   :  { %v1101_v31 = vpop.f32.mrf.mxu0 }
 0x372   :  { %v1103_v33 = vpop.f32.mrf.mxu0 }
 0x373   :  { %v1532_v32 = vpack.c.bf16 %v1103_v33, %v1101_v31 }
 0x375   :  { %1572 = vst [vmem:[%s2036_s10 + $0x48] sm:$0xff] %v1532_v32  }
 0x37a   :  { %v1106_v34 = vpop.f32.mrf.mxu0 }
 0x382   :  { %v1108_v35 = vpop.f32.mrf.mxu0 }
 0x383   :  { %v1537_v36 = vpack.c.bf16 %v1108_v35, %v1106_v34 }
 0x385   :  { %1573 = vst [vmem:[%s2036_s10 + $0x50] sm:$0xff] %v1537_v36  }
 0x38a   :  { %v1111_v37 = vpop.f32.mrf.mxu0 }
 0x392   :  { %v1113_v39 = vpop.f32.mrf.mxu0 }
 0x393   :  { %v1542_v40 = vpack.c.bf16 %v1113_v39, %v1111_v37 }
 0x395   :  { %1574 = vst [vmem:[%s2036_s10 + $0x58] sm:$0xff] %v1542_v40  }
 0x39a   :  { %v1116_v41 = vpop.f32.mrf.mxu0 }
 0x3a2   :  { %v1118_v42 = vpop.f32.mrf.mxu0 }
 0x3a3   :  { %v1547_v43 = vpack.c.bf16 %v1118_v42, %v1116_v41 }
 0x3a5   :  { %1575 = vst [vmem:[%s2036_s10 + $0x60] sm:$0xff] %v1547_v43  }
 0x3aa   :  { %v1121_v45 = vpop.f32.mrf.mxu0 }
 0x3b2   :  { %v1123_v46 = vpop.f32.mrf.mxu0 }
 0x3b3   :  { %v1552_v47 = vpack.c.bf16 %v1123_v46, %v1121_v45 }
 0x3b5   :  { %1576 = vst [vmem:[%s2036_s10 + $0x68] sm:$0xff] %v1552_v47  }
 0x3ba   :  { %v1126_v48 = vpop.f32.mrf.mxu0 }
 0x3c2   :  { %v1128_v49 = vpop.f32.mrf.mxu0 }
 0x3c3   :  { %v1557_v50 = vpack.c.bf16 %v1128_v49, %v1126_v48 }
 0x3c5   :  { %1577 = vst [vmem:[%s2036_s10 + $0x70] sm:$0xff] %v1557_v50  }
 0x3ca   :  { %v1131_v51 = vpop.f32.mrf.mxu0 }
 0x3d2   :  { %v1133_v52 = vpop.f32.mrf.mxu0 }
 0x3d3   :  { %v1562_v53 = vpack.c.bf16 %v1133_v52, %v1131_v51 }
 0x3d5   :  { %1578 = vst [vmem:[%s2036_s10 + $0x78] sm:$0xff] %v1562_v53  }

</bundles_post_ra>
